<compile_context>
chip_gen: v7x
topology: tpu7x:2x2x1
jax: 0.10.0
libtpu: 0.0.40
codegen_flags: <defaults>
</compile_context>

<pallas_src>
import functools

import jax
import jax.numpy as jnp
from jax.experimental import pallas as pl
from jax.experimental.pallas import tpu as pltpu


def _round_up(x, m):
    return (x + m - 1) // m * m


def _mlp_kernel(x_ref, w1_ref, b1_ref, w2_ref, b2_ref, w3_ref, b3_ref, o_ref):
    # Layer 1: cast the activation tile to the weight dtype (bf16) only for
    # the matmul; accumulate in f32 on the MXU, bias/ReLU in f32 on the VPU.
    h1 = jnp.dot(x_ref[...].astype(w1_ref.dtype), w1_ref[...],
                 preferred_element_type=jnp.float32)
    h1 = jnp.maximum(h1 + b1_ref[...], 0.0)
    # Layer 2.
    h2 = jnp.dot(h1.astype(w2_ref.dtype), w2_ref[...],
                 preferred_element_type=jnp.float32)
    h2 = jnp.maximum(h2 + b2_ref[...], 0.0)
    # Layer 3: output columns are zero-padded to a lane-dense multiple of 128.
    out = jnp.dot(h2.astype(w3_ref.dtype), w3_ref[...],
                  preferred_element_type=jnp.float32)
    o_ref[...] = (out + b3_ref[...]).astype(o_ref.dtype)


@functools.partial(jax.jit, static_argnames=("batch_tile", "use_bf16"))
def feature_extractor(data, params, batch_tile=512, use_bf16=True):
    """data: [B, state_dim + action_dim] float32 -> [B, num_feature] float32."""
    w1, b1, w2, b2, w3, b3 = params
    B, d_in = data.shape
    num_feature = w3.shape[1]

    # --- lane-dense output: zero-pad last layer to a multiple of 128 cols ---
    nf_pad = max(128, _round_up(num_feature, 128))
    if nf_pad != num_feature:
        w3 = jnp.pad(w3, ((0, 0), (0, nf_pad - num_feature)))
        b3 = jnp.pad(b3, ((0, 0), (0, nf_pad - num_feature)))

    # --- bf16 matmul operands for the (tiny, VMEM-resident) weights.  The
    # activation `data` is NOT cast here: the cast happens inside the kernel
    # so we avoid an extra full-array HBM pass in the wrapper.
    if use_bf16:
        w1 = w1.astype(jnp.bfloat16)
        w2 = w2.astype(jnp.bfloat16)
        w3 = w3.astype(jnp.bfloat16)
    b1 = b1.astype(jnp.float32)
    b2 = b2.astype(jnp.float32)
    b3 = b3.astype(jnp.float32)

    # --- batch tiling: no input padding; ragged tail -> Pallas boundary block
    bt = max(8, _round_up(min(batch_tile, _round_up(B, 8)), 8))
    # Prefer >= 2 grid steps so the "parallel" batch axis can shard across
    # both TensorCores on v7x; irrelevant (and skipped) for tiny batches.
    if pl.cdiv(B, bt) < 2 and B > 8:
        bt = max(8, _round_up(pl.cdiv(_round_up(B, 8), 2), 8))
    grid = (pl.cdiv(B, bt),)

    hidden1, hidden2 = w1.shape[1], w2.shape[1]
    nbytes = lambda a: a.size * a.dtype.itemsize
    cost = pl.CostEstimate(
        flops=2 * B * (d_in * hidden1 + hidden1 * hidden2 + hidden2 * nf_pad),
        transcendentals=0,
        bytes_accessed=(nbytes(data) + nbytes(w1) + nbytes(w2) + nbytes(w3)
                        + nbytes(b1) + nbytes(b2) + nbytes(b3)
                        + B * nf_pad * 4),
    )

    out = pl.pallas_call(
        _mlp_kernel,
        out_shape=jax.ShapeDtypeStruct((B, nf_pad), jnp.float32),
        grid_spec=pltpu.PrefetchScalarGridSpec(
            num_scalar_prefetch=0,
            grid=grid,
            in_specs=[
                pl.BlockSpec((bt, d_in), lambda i: (i, 0)),   # x tile
                # Weights/biases: full arrays, grid-invariant index maps so
                # they stay resident in VMEM across all grid steps.
                pl.BlockSpec(w1.shape, lambda i: (0, 0)),
                pl.BlockSpec(b1.shape, lambda i: (0, 0)),
                pl.BlockSpec(w2.shape, lambda i: (0, 0)),
                pl.BlockSpec(b2.shape, lambda i: (0, 0)),
                pl.BlockSpec(w3.shape, lambda i: (0, 0)),
                pl.BlockSpec(b3.shape, lambda i: (0, 0)),
            ],
            out_specs=pl.BlockSpec((bt, nf_pad), lambda i: (i, 0)),
        ),
        compiler_params=pltpu.CompilerParams(
            dimension_semantics=("parallel",)),
        cost_estimate=cost,
    )(data, w1, b1, w2, b2, w3, b3)

    return out[:, :num_feature]


def init_params(key, state_dim, action_dim, num_feature):
    """Deterministic PyTorch-style (Kaiming-uniform) init; weights returned
    already transposed to (in, out)."""
    d_in = state_dim + action_dim
    dims = [(d_in, 256), (256, 128), (128, num_feature)]
    params = []
    keys = jax.random.split(key, 2 * len(dims))
    for li, (fan_in, fan_out) in enumerate(dims):
        bound = 1.0 / (fan_in ** 0.5)
        w = jax.random.uniform(keys[2 * li], (fan_in, fan_out),
                               jnp.float32, -bound, bound)
        b = jax.random.uniform(keys[2 * li + 1], (1, fan_out),
                               jnp.float32, -bound, bound)
        params += [w, b]
    return tuple(params)


def _reference(data, params):
    w1, b1, w2, b2, w3, b3 = params
    q = jax.nn.relu(data @ w1 + b1)
    q = jax.nn.relu(q @ w2 + b2)
    return q @ w3 + b3


if __name__ == "__main__":
    key = jax.random.PRNGKey(0)
    k_data, k_param = jax.random.split(key)

    state_dim, action_dim, num_feature = 8, 4, 32
    batch = 2

    data = jax.random.normal(k_data, (batch, state_dim + action_dim),
                             jnp.float32)
    params = init_params(k_param, state_dim, action_dim, num_feature)

    out = feature_extractor(data, params)
    out = jax.block_until_ready(out)

    ref = _reference(data, params)
    assert out.shape == (batch, num_feature)
    # bf16 matmul operands (f32 accumulate) -> ~1e-2 relative error vs f32 ref.
    assert jnp.allclose(out, ref, atol=5e-2, rtol=5e-2), "mismatch vs reference"

    print("KERNEL_OK")
</pallas_src>

<mosaic_0001>
module attributes {stable_mosaic.version = 11 : i64} {
  func.func @_mlp_kernel(%arg0: i32, %arg1: memref<8x12xf32, #tpu.memory_space<vmem>>, %arg2: memref<12x256xbf16, #tpu.memory_space<vmem>>, %arg3: memref<1x256xf32, #tpu.memory_space<vmem>>, %arg4: memref<256x128xbf16, #tpu.memory_space<vmem>>, %arg5: memref<1x128xf32, #tpu.memory_space<vmem>>, %arg6: memref<128x128xbf16, #tpu.memory_space<vmem>>, %arg7: memref<1x128xf32, #tpu.memory_space<vmem>>, %arg8: memref<8x128xf32, #tpu.memory_space<vmem>>) attributes {dimension_semantics = [#tpu.dimension_semantics<parallel>], iteration_bounds = array<i64: 1>, scalar_prefetch = 0 : i64, scratch_operands = 0 : i64, tpu.core_type = #tpu.core_type<tc>, window_params = [{transform_indices = @transform_0, window_bounds = array<i64: 8, 12>}, {pipeline_mode = #tpu.pipeline_mode<synchronous>, transform_indices = @transform_1, window_bounds = array<i64: 12, 256>}, {pipeline_mode = #tpu.pipeline_mode<synchronous>, transform_indices = @transform_2, window_bounds = array<i64: 1, 256>}, {pipeline_mode = #tpu.pipeline_mode<synchronous>, transform_indices = @transform_3, window_bounds = array<i64: 256, 128>}, {pipeline_mode = #tpu.pipeline_mode<synchronous>, transform_indices = @transform_4, window_bounds = array<i64: 1, 128>}, {pipeline_mode = #tpu.pipeline_mode<synchronous>, transform_indices = @transform_5, window_bounds = array<i64: 128, 128>}, {pipeline_mode = #tpu.pipeline_mode<synchronous>, transform_indices = @transform_6, window_bounds = array<i64: 1, 128>}, {transform_indices = @transform_7, window_bounds = array<i64: 8, 128>}]} {
    %c0 = arith.constant 0 : index
    %c0_0 = arith.constant 0 : index
    %0 = vector.load %arg1[%c0, %c0_0] : memref<8x12xf32, #tpu.memory_space<vmem>>, vector<8x12xf32>
    %1 = arith.truncf %0 : vector<8x12xf32> to vector<8x12xbf16>
    %c0_1 = arith.constant 0 : index
    %c0_2 = arith.constant 0 : index
    %2 = vector.load %arg2[%c0_1, %c0_2] : memref<12x256xbf16, #tpu.memory_space<vmem>>, vector<12x256xbf16>
    %cst = arith.constant dense<0.000000e+00> : vector<8x256xf32>
    %3 = tpu.matmul %1, %2, %cst {dimension_numbers = #tpu.dot_dimension_numbers<[1], [0], [0], [1], [0, 0, 1, 1], [], []>} : vector<8x12xbf16>, vector<12x256xbf16>, vector<8x256xf32> -> vector<8x256xf32>
    %c0_3 = arith.constant 0 : index
    %c0_4 = arith.constant 0 : index
    %4 = vector.load %arg3[%c0_3, %c0_4] : memref<1x256xf32, #tpu.memory_space<vmem>>, vector<1x256xf32>
    %5 = vector.broadcast %4 : vector<1x256xf32> to vector<8x256xf32>
    %6 = arith.addf %3, %5 : vector<8x256xf32>
    %cst_5 = arith.constant 0.000000e+00 : f32
    %7 = vector.broadcast %cst_5 : f32 to vector<8x256xf32>
    %8 = arith.maximumf %6, %7 : vector<8x256xf32>
    %9 = arith.truncf %8 : vector<8x256xf32> to vector<8x256xbf16>
    %c0_6 = arith.constant 0 : index
    %c0_7 = arith.constant 0 : index
    %10 = vector.load %arg4[%c0_6, %c0_7] : memref<256x128xbf16, #tpu.memory_space<vmem>>, vector<256x128xbf16>
    %cst_8 = arith.constant dense<0.000000e+00> : vector<8x128xf32>
    %11 = tpu.matmul %9, %10, %cst_8 {dimension_numbers = #tpu.dot_dimension_numbers<[1], [0], [0], [1], [0, 0, 1, 1], [], []>} : vector<8x256xbf16>, vector<256x128xbf16>, vector<8x128xf32> -> vector<8x128xf32>
    %c0_9 = arith.constant 0 : index
    %c0_10 = arith.constant 0 : index
    %12 = vector.load %arg5[%c0_9, %c0_10] : memref<1x128xf32, #tpu.memory_space<vmem>>, vector<1x128xf32>
    %13 = vector.broadcast %12 : vector<1x128xf32> to vector<8x128xf32>
    %14 = arith.addf %11, %13 : vector<8x128xf32>
    %cst_11 = arith.constant 0.000000e+00 : f32
    %15 = vector.broadcast %cst_11 : f32 to vector<8x128xf32>
    %16 = arith.maximumf %14, %15 : vector<8x128xf32>
    %17 = arith.truncf %16 : vector<8x128xf32> to vector<8x128xbf16>
    %c0_12 = arith.constant 0 : index
    %c0_13 = arith.constant 0 : index
    %18 = vector.load %arg6[%c0_12, %c0_13] : memref<128x128xbf16, #tpu.memory_space<vmem>>, vector<128x128xbf16>
    %cst_14 = arith.constant dense<0.000000e+00> : vector<8x128xf32>
    %19 = tpu.matmul %17, %18, %cst_14 {dimension_numbers = #tpu.dot_dimension_numbers<[1], [0], [0], [1], [0, 0, 1, 1], [], []>} : vector<8x128xbf16>, vector<128x128xbf16>, vector<8x128xf32> -> vector<8x128xf32>
    %c0_15 = arith.constant 0 : index
    %c0_16 = arith.constant 0 : index
    %20 = vector.load %arg7[%c0_15, %c0_16] : memref<1x128xf32, #tpu.memory_space<vmem>>, vector<1x128xf32>
    %21 = vector.broadcast %20 : vector<1x128xf32> to vector<8x128xf32>
    %22 = arith.addf %19, %21 : vector<8x128xf32>
    %c0_17 = arith.constant 0 : index
    %c0_18 = arith.constant 0 : index
    %23 = vector.load %arg8[%c0_17, %c0_18] : memref<8x128xf32, #tpu.memory_space<vmem>>, vector<8x128xf32>
    tpu.vector_store %arg8[%c0_17, %c0_18], %22 {strides = array<i32>} : memref<8x128xf32, #tpu.memory_space<vmem>>, vector<8x128xf32>,
    return
  }
  func.func @transform_0(%arg0: i32) -> (i32, i32) {
    %c0_i32 = arith.constant 0 : i32
    %c0_i32_0 = arith.constant 0 : i32
    return %arg0, %c0_i32 : i32, i32
  }
  func.func @transform_1(%arg0: i32) -> (i32, i32) {
    %c0_i32 = arith.constant 0 : i32
    %c0_i32_0 = arith.constant 0 : i32
    %c0_i32_1 = arith.constant 0 : i32
    return %c0_i32, %c0_i32_0 : i32, i32
  }
  func.func @transform_2(%arg0: i32) -> (i32, i32) {
    %c0_i32 = arith.constant 0 : i32
    %c0_i32_0 = arith.constant 0 : i32
    %c0_i32_1 = arith.constant 0 : i32
    return %c0_i32, %c0_i32_0 : i32, i32
  }
  func.func @transform_3(%arg0: i32) -> (i32, i32) {
    %c0_i32 = arith.constant 0 : i32
    %c0_i32_0 = arith.constant 0 : i32
    %c0_i32_1 = arith.constant 0 : i32
    return %c0_i32, %c0_i32_0 : i32, i32
  }
  func.func @transform_4(%arg0: i32) -> (i32, i32) {
    %c0_i32 = arith.constant 0 : i32
    %c0_i32_0 = arith.constant 0 : i32
    %c0_i32_1 = arith.constant 0 : i32
    return %c0_i32, %c0_i32_0 : i32, i32
  }
  func.func @transform_5(%arg0: i32) -> (i32, i32) {
    %c0_i32 = arith.constant 0 : i32
    %c0_i32_0 = arith.constant 0 : i32
    %c0_i32_1 = arith.constant 0 : i32
    return %c0_i32, %c0_i32_0 : i32, i32
  }
  func.func @transform_6(%arg0: i32) -> (i32, i32) {
    %c0_i32 = arith.constant 0 : i32
    %c0_i32_0 = arith.constant 0 : i32
    %c0_i32_1 = arith.constant 0 : i32
    return %c0_i32, %c0_i32_0 : i32, i32
  }
  func.func @transform_7(%arg0: i32) -> (i32, i32) {
    %c0_i32 = arith.constant 0 : i32
    %c0_i32_0 = arith.constant 0 : i32
    return %arg0, %c0_i32 : i32, i32
  }
}

</mosaic_0001>

<bundles_post_ra>
// kernel: feature_extractor.1
= control target key start
LH: loop header
LB: loop body
LE: loop exit
PB: predicated region body
PF: predicated region fallthrough
CT: control target
= control target key end

     0   :  { %12 = vsyncpa [#allocation3], 0  ;;  %vm56_vm0 = vcmask 1045504   ;;  %vm52_vm1 = vcmask 97280   ;;  %v551_v5 = vmov 0   ;;  %v552_v23 = vmov 0.0   ;;  %s699_s0 = inlined_call_operand.vmem [shape: f32[2,12], index: 0, kind: input, shape index: {}]   ;;  %s700_s1 = inlined_call_operand.vmem [shape: bf16[12,256], index: 1, kind: input, shape index: {}]   ;;  %s701_s2 = inlined_call_operand.vmem [shape: f32[1,256], index: 2, kind: input, shape index: {}]   ;;  %s702_s3 = inlined_call_operand.vmem [shape: bf16[256,128], index: 3, kind: input, shape index: {}]   ;;  %s703_s4 = inlined_call_operand.vmem [shape: f32[1,128], index: 4, kind: input, shape index: {}]   ;;  %s704_s5 = inlined_call_operand.vmem [shape: bf16[128,128], index: 5, kind: input, shape index: {}]   ;;  %s705_s6 = inlined_call_operand.vmem [shape: f32[1,128], index: 6, kind: input, shape index: {}]   ;;  %s706_s7 = inlined_call_operand.hbm [shape: f32[2,128], index: 7, kind: output, shape index: {}]  }
   0x1   :  { %v500_v0 = vld [vmem:[%s700_s1 + $0x4] ss:$8 sps:$4 sm:$0x3f]   ;;  %v502_v1 = vld [vmem:[%s700_s1] ss:$8 sps:$4 sm:$0x3f]   ;;  %95 = vmatprep.mubr.bf16.mxu0 %v551_v5  ;;  %v34_v29 = vlaneseq }
   0x2   :  { %v28_v2 = vld [vmem:[%s699_s0] sm:$0xff]  ;;  %415 = vmatprep.subr.msk.bf16.mxu0 %vm56_vm0, %v500_v0  ;;  %v58_v4 = vsel %vm56_vm0, %v502_v1, 0  ;;  %v505_v8 = vld [vmem:[%s702_s3 + $0x48] sm:$0xff]   ;;  %v507_v10 = vld [vmem:[%s702_s3 + $0x50] sm:$0xff]   ;;  %vm553_vm2 = vmmov 0  }
   0x3   :  { %v503_v3 = vld [vmem:[%s702_s3 + $0x40] sm:$0xff]   ;;  %v29_v6 = vpack.c.bf16 %v28_v2, %v28_v2  ;;  %64 = vmatpush1.bf16.msra.mxu0 %v58_v4  ;;  %v506_v9 = vld [vmem:[%s702_s3 + $0x8] sm:$0xff]   ;;  %v508_v11 = vld [vmem:[%s702_s3 + $0x10] sm:$0xff]   ;;  %v35_v30 = vshrl.u32 %v34_v29, 7 }
   0x4   :  { %v504_v7 = vld [vmem:[%s702_s3] sm:$0xff]   ;;  %443 = vmatprep.subr.bf16.mxu1 %v503_v3  ;;  %v509_v12 = vld [vmem:[%s702_s3 + $0x58] sm:$0xff]   ;;  %v513_v16 = vld [vmem:[%s702_s3 + $0x68] sm:$0xff]   ;;  %474 = vmatprep.subr.bf16.mxu0 %v552_v23 }
   0x5   :  { %444 = vmatpush3.bf16.msra.mxu1 %v504_v7  ;;  %v510_v13 = vld [vmem:[%s702_s3 + $0x18] sm:$0xff]   ;;  %v511_v14 = vld [vmem:[%s702_s3 + $0x60] sm:$0xff]   ;;  %v514_v17 = vld [vmem:[%s702_s3 + $0x28] sm:$0xff]   ;;  %v36_v31 = vsub.s32 0, %v35_v30  ;;  %v40_v33 = vsub.s32 1, %v35_v30 }
   0x6   :  { %416 = vmatmul.mubr.msk.bf16.vlgmr.msra.gmra.mrb[0].mxu0 %vm52_vm1, %v29_v6  ;;  %445 = vmatprep.subr.bf16.mxu1 %v505_v8  ;;  %v512_v15 = vld [vmem:[%s702_s3 + $0x20] sm:$0xff]   ;;  %v515_v18 = vld [vmem:[%s702_s3 + $0x70] sm:$0xff]   ;;  %v517_v20 = vld [vmem:[%s702_s3 + $0x78] sm:$0xff]  }
   0x7   :  { %v516_v19 = vld [vmem:[%s702_s3 + $0x30] sm:$0xff]   ;;  %v518_v21 = vld [vmem:[%s702_s3 + $0x38] sm:$0xff]   ;;  %v519_v22 = vld [vmem:[%s704_s5] sm:$0xff]   ;;  %490 = vmatprep.mubr.msk.bf16.mxu0 %vm553_vm2, %v552_v23 }
   0x8   :  { %475 = vmatpush3.bf16.msra.mxu0 %v519_v22  ;;  %v520_v24 = vld [vmem:[%s704_s5 + $0x8] sm:$0xff]   ;;  %v521_v25 = vld [vmem:[%s704_s5 + $0x10] sm:$0xff]   ;;  %v522_v26 = vld [vmem:[%s704_s5 + $0x18] sm:$0xff]  }
   0x9   :  { %446 = vmatpush3.bf16.msra.mxu1 %v506_v9  ;;  %476 = vmatprep.subr.bf16.mxu0 %v552_v23  ;;  %v523_v27 = vld [vmem:[%s704_s5 + $0x20] sm:$0xff]   ;;  %v524_v28 = vld [vmem:[%s704_s5 + $0x28] sm:$0xff]   ;;  %v525_v46 = vld [vmem:[%s704_s5 + $0x30] sm:$0xff]  }
   0xa   :  { %447 = vmatprep.subr.bf16.mxu1 %v507_v10  ;;  %v32_v32 = vld [vmem:[%s701_s2] sm:$0x3]  ;;  %v526_v47 = vld [vmem:[%s704_s5 + $0x38] sm:$0xff]  }
   0xb   :  { %v37_v34 = vrot.slane %v32_v32, %v36_v31  ;;  %v41_v35 = vrot.slane %v32_v32, %v40_v33  ;;  %v417_v49 = vld [vmem:[%s703_s4] ss:$0 sm:$0xff] }
   0xc   :  { %477 = vmatpush3.bf16.msra.mxu0 %v520_v24  ;;  %v434_v57 = vld [vmem:[%s705_s6] ss:$0 sm:$0xff] }
   0xd   :  { %448 = vmatpush3.bf16.msra.mxu1 %v508_v11  ;;  %478 = vmatprep.subr.bf16.mxu0 %v552_v23 }
   0xe   :  { %449 = vmatprep.subr.bf16.mxu1 %v509_v12 }
  0x10   :  { %479 = vmatpush3.bf16.msra.mxu0 %v521_v25 }
  0x11   :  { %450 = vmatpush3.bf16.msra.mxu1 %v510_v13  ;;  %480 = vmatprep.subr.bf16.mxu0 %v552_v23 }
  0x12   :  { %451 = vmatprep.subr.bf16.mxu1 %v511_v14 }
  0x14   :  { %481 = vmatpush3.bf16.msra.mxu0 %v522_v26 }
  0x15   :  { %452 = vmatpush3.bf16.msra.mxu1 %v512_v15  ;;  %482 = vmatprep.subr.bf16.mxu0 %v552_v23 }
  0x16   :  { %453 = vmatprep.subr.bf16.mxu1 %v513_v16 }
  0x18   :  { %483 = vmatpush3.bf16.msra.mxu0 %v523_v27 }
  0x19   :  { %454 = vmatpush3.bf16.msra.mxu1 %v514_v17  ;;  %484 = vmatprep.subr.bf16.mxu0 %v552_v23 }
  0x1a   :  { %455 = vmatprep.subr.bf16.mxu1 %v515_v18 }
  0x1c   :  { %485 = vmatpush3.bf16.msra.mxu0 %v524_v28 }
  0x1d   :  { %456 = vmatpush3.bf16.msra.mxu1 %v516_v19  ;;  %486 = vmatprep.subr.bf16.mxu0 %v552_v23 }
  0x1e   :  { %457 = vmatprep.subr.bf16.mxu1 %v517_v20 }
  0x20   :  { %487 = vmatpush3.bf16.msra.mxu0 %v525_v46 }
  0x21   :  { %458 = vmatpush3.bf16.msra.mxu1 %v518_v21  ;;  %488 = vmatprep.subr.bf16.mxu0 %v552_v23 }
  0x24   :  { %489 = vmatpush3.bf16.msra.mxu0 %v526_v47 }
  0xd9   :  { %v97_v36 = vpop.f32.mrb[0].mxu0 }
  0xda   :  { %v98_v37 = vadd.f32 %v97_v36, %v37_v34  ;;  %v99_v38 = vpop.f32.mrb[1].mxu0 }
  0xdb   :  { %v100_v39 = vadd.f32 %v99_v38, %v41_v35  ;;  %v101_v40 = vpop.f32.mrb[2].mxu0 }
  0xdc   :  { %v104_v41 = vmax.f32 %v98_v37, 0.0  ;;  %v102_v42 = vpop.f32.mrb[3].mxu0 }
  0xdd   :  { %v105_v43 = vmax.f32 %v100_v39, 0.0 }
  0xde   :  { %v106_v45 = vpack.c.bf16 %v104_v41, %v104_v41 }
  0xdf   :  { %v107_v44 = vpack.c.bf16 %v105_v43, %v105_v43 }
  0xe1   :  { %275 = vmatprep.mubr.bf16.mxu1 %v107_v44 }
  0xe2   :  { %276 = vmatmul.mubr.bf16.vlgmr.msra.gmra.mrb[0].mxu1 %v106_v45 }
 0x1b5   :  { %v459_v48 = vpop.f32.mrb[0].mxu1 }
 0x1b6   :  { %v460_v50 = vpop.f32.mrb[1].mxu1 }
 0x1b7   :  { %v461_v51 = vadd.f32 %v460_v50, %v459_v48  ;;  %v462_v52 = vpop.f32.mrb[2].mxu1 }
 0x1b8   :  { %v463_v53 = vpop.f32.mrb[3].mxu1 }
 0x1b9   :  { %v278_v54 = vadd.f32 %v461_v51, %v417_v49 }
 0x1bb   :  { %v283_v55 = vmax.f32 %v278_v54, 0.0 }
 0x1bd   :  { %v284_v56 = vpack.c.bf16 %v283_v55, %v283_v55 }
 0x1bf   :  { %491 = vmatmul.mubr.bf16.vlgmr.msra.gmra.mrb[4].mxu0 %v284_v56 }
 0x292   :  { %v390_v58 = vpop.f32.mrb[4].mxu0 }
 0x293   :  { %v391_v59 = vadd.f32 %v434_v57, %v390_v58  ;;  %v492_v60 = vpop.f32.mrb[5].mxu0 }
 0x294   :  { %v393_v61 = vpop.f32.mrb[6].mxu0 }
 0x295   :  { %396 = vst [vmem:[#allocation2] sm:$0xff] %v391_v59  ;;  %v493_v62 = vpop.f32.mrb[7].mxu0 }
 0x296   :  { %401 = vsyncadd [#allocation3], 96  ;;  %s554_s4 = smov [#allocation2]  }
 0x297   :  { %s402_s5 = sshll.u32 %s554_s4, 4  ;;  %s403_s5 = int_to_ptr.vmem [resolvable:$true] %s402_s5 }
 0x298   :  { %s527_s9 = scalar_lea.vmem %s403_s5, 32  ;;  %s531_s10 = scalar_lea.vmem %s403_s5, 128 }
 0x299   :  { %p528_p0 = scmp.ne.s32.totalorder %s403_s5, %s527_s9  ;;  %p532_p1 = scmp.lt.s32.totalorder %s403_s5, %s403_s5 }
 0x29a   :  { %p533_p2 = scmp.lt.s32.totalorder %s531_s10, %s527_s9 }
 0x29c   :  { %p534_p3 = por %p533_p2, %p532_p1 }
 0x29e   :  { %p535_p4 = pnand %p534_p3, %p528_p0 }
 0x2a0   :  { %538 = shalt.err (!%p535_p4)
}
 0x2a1   :  { %s539_s11 = scalar_lea.hbm %s706_s7, 32 }
 0x2a2   :  { %p540_p5 = scmp.ne.s32.totalorder %s706_s7, %s539_s11  ;;  %p543_p6 = scmp.lt.u32.totalorder %s539_s11, %s706_s7 }
 0x2a4   :  { %p545_p7 = pnand %p543_p6, %p540_p5 }
 0x2a6   :  { %548 = shalt.err (!%p545_p7)
}
 0x2a7   :  { %s555_s15 = smov 32   ;;  %s556_s16 = smov 2  }
 0x2a8   :  { %408 = dma.vmem_to_hbm [thread:$0]  %s403_s5, 32, %s706_s7, [#allocation3], %s555_s15, %s555_s15, %s556_s16  }
 0x2a9   :  { %549 = dma.done.wait [#allocation3], 128  }
 0x2aa   :  { %550 = vsyncadd [#allocation3], 4294967168 }
 0x2ab   :  { %412 = vsyncpa [#allocation3], 1 }

</bundles_post_ra>
